<compile_context>
chip_gen: v7x
topology: tpu7x:2x2x1
jax: 0.10.0
libtpu: 0.0.40
codegen_flags: <defaults>
</compile_context>

<pallas_src>
import jax
import jax.numpy as jnp
from jax import lax
from jax.experimental import pallas as pl
from jax.experimental.pallas import tpu as pltpu


def _make_skipgram_kernel():
    EPS2 = 1e-16  # (1e-8)^2 — plain Python float, lowers as a literal

    def kernel(_cen_idx_ref, _pos_idx_ref, _neg_idx_ref,   # scalar prefetch (SMEM)
               cen_ref, pos_ref, neg_ref,                   # (1, 1, H) gathered rows
               pos_out_ref, neg_out_ref):                   # (1, 1) f32 accumulators
        i = pl.program_id(0)   # pair index
        j = pl.program_id(1)   # negative index within the pair

        @pl.when(jnp.logical_and(i == 0, j == 0))
        def _():
            pos_out_ref[...] = jnp.zeros_like(pos_out_ref)
            neg_out_ref[...] = jnp.zeros_like(neg_out_ref)

        cen = cen_ref[0]                                            # (1, H)
        na2 = jnp.maximum(jnp.sum(cen * cen, -1, keepdims=True), EPS2)   # (1, 1)

        # Positive term: once per pair (first inner step only).
        @pl.when(j == 0)
        def _():
            pos = pos_ref[0]                                        # (1, H)
            nb2 = jnp.maximum(jnp.sum(pos * pos, -1, keepdims=True), EPS2)
            dcp = jnp.sum(cen * pos, -1, keepdims=True)
            pos_out_ref[...] += dcp * lax.rsqrt(na2 * nb2)

        # Negative term: every inner step.
        neg = neg_ref[0]                                            # (1, H)
        nn2 = jnp.maximum(jnp.sum(neg * neg, -1, keepdims=True), EPS2)
        dcn = jnp.sum(cen * neg, -1, keepdims=True)
        neg_out_ref[...] += dcn * lax.rsqrt(na2 * nn2)

    return kernel


def skipgram_forward(w2v, center, pos_word, neg_word, *, sample_n, neg_rate):
    """Returns (loss, pos, neg) matching SkipGramModel.forward semantics."""
    b = center.shape[0]
    n_pairs = b * sample_n
    V, H = w2v.shape

    cen_idx = center.reshape(-1).astype(jnp.int32)                   # (n_pairs,)
    pos_idx = pos_word.reshape(-1).astype(jnp.int32)                 # (n_pairs,)
    # torch pairs neg_word[b, 0, j*sample_n + s] with center[b, 0, s]; regroup so
    # pair i = b*sample_n + s owns its neg_rate negatives contiguously.
    neg_idx = jnp.transpose(neg_word.reshape(b, neg_rate, sample_n),
                            (0, 2, 1)).reshape(-1).astype(jnp.int32)  # (n_pairs*neg_rate,)

    # (V, 1, H) so the gathered block (1, 1, H) exactly matches the array's
    # last two dims — no (8, 128) tiling constraint on the row gather.
    w2v3 = w2v.astype(jnp.float32).reshape(V, 1, H)

    kernel = _make_skipgram_kernel()

    row_spec = lambda pick: pl.BlockSpec((1, 1, H), pick)
    grid_spec = pltpu.PrefetchScalarGridSpec(
        num_scalar_prefetch=3,
        grid=(n_pairs, neg_rate),
        in_specs=[
            row_spec(lambda i, j, c, p, g: (c[i], 0, 0)),                       # center
            row_spec(lambda i, j, c, p, g: (p[i], 0, 0)),                       # positive
            row_spec(lambda i, j, c, p, g: (g[i * neg_rate + j], 0, 0)),        # negative
        ],
        out_specs=(pl.BlockSpec((1, 1), lambda i, j, c, p, g: (0, 0)),
                   pl.BlockSpec((1, 1), lambda i, j, c, p, g: (0, 0))),
    )

    pos_sum, neg_sum = pl.pallas_call(
        kernel,
        out_shape=(jax.ShapeDtypeStruct((1, 1), jnp.float32),
                   jax.ShapeDtypeStruct((1, 1), jnp.float32)),
        grid_spec=grid_spec,
        compiler_params=pltpu.CompilerParams(
            dimension_semantics=("arbitrary", "arbitrary")),
    )(cen_idx, pos_idx, neg_idx, w2v3, w2v3, w2v3)

    pos = pos_sum[0, 0] / sample_n / b / 2.0 + 0.5
    neg = neg_sum[0, 0] / sample_n / neg_rate / b / 2.0 + 0.5
    loss = 1.0 - pos + neg
    # TODO(synk): torch module prints 'pos/neg' inside forward; host can print
    # from the returned scalars instead of an in-kernel side effect.
    return loss, pos, neg


def _reference(w2v, center, pos_word, neg_word, sample_n, neg_rate):
    b = center.shape[0]

    def cos(a, c):
        dot = jnp.sum(a * c, axis=-1)
        na = jnp.maximum(jnp.sqrt(jnp.sum(a * a, axis=-1)), 1e-8)
        nc = jnp.maximum(jnp.sqrt(jnp.sum(c * c, axis=-1)), 1e-8)
        return dot / (na * nc)

    cv = w2v[center.reshape(-1)]
    pv = w2v[pos_word.reshape(-1)]
    nv = w2v[neg_word.reshape(-1)]
    cvr = w2v[jnp.tile(center, (1, 1, neg_rate)).reshape(-1)]
    pos = cos(cv, pv).sum() / sample_n / b / 2.0 + 0.5
    neg = cos(cvr, nv).sum() / sample_n / neg_rate / b / 2.0 + 0.5
    return 1.0 - pos + neg, pos, neg


if __name__ == "__main__":
    V, H = 64, 32                 # len(vocab), hiddem_dim
    b, sample_n, neg_rate = 2, 4, 3

    key = jax.random.PRNGKey(0)
    k_w, k_c, k_p, k_n = jax.random.split(key, 4)

    # nn.init.kaiming_normal_ on (V, H): fan_in = H, gain = sqrt(2) => std = sqrt(2/H)
    w2v = jax.random.normal(k_w, (V, H), jnp.float32) * jnp.sqrt(2.0 / H)

    center = jax.random.randint(k_c, (b, 1, sample_n), 0, V, jnp.int32)
    pos_word = jax.random.randint(k_p, (b, 1, sample_n), 0, V, jnp.int32)
    neg_word = jax.random.randint(k_n, (b, 1, sample_n * neg_rate), 0, V, jnp.int32)

    loss, pos, neg = skipgram_forward(w2v, center, pos_word, neg_word,
                                      sample_n=sample_n, neg_rate=neg_rate)
    jax.block_until_ready(loss)

    ref_loss, ref_pos, ref_neg = _reference(w2v, center, pos_word, neg_word,
                                            sample_n, neg_rate)
    assert jnp.allclose(loss, ref_loss, atol=1e-5, rtol=1e-5), (loss, ref_loss)
    assert jnp.allclose(pos, ref_pos, atol=1e-5, rtol=1e-5), (pos, ref_pos)
    assert jnp.allclose(neg, ref_neg, atol=1e-5, rtol=1e-5), (neg, ref_neg)

    print("KERNEL_OK")
</pallas_src>

<mosaic_0001>
module attributes {stable_mosaic.version = 11 : i64} {
  func.func @kernel(%arg0: i32, %arg1: i32, %arg2: memref<8xi32, #tpu.memory_space<smem>>, %arg3: memref<8xi32, #tpu.memory_space<smem>>, %arg4: memref<24xi32, #tpu.memory_space<smem>>, %arg5: memref<1x1x32xf32, #tpu.memory_space<vmem>>, %arg6: memref<1x1x32xf32, #tpu.memory_space<vmem>>, %arg7: memref<1x1x32xf32, #tpu.memory_space<vmem>>, %arg8: memref<1x1xf32, #tpu.memory_space<vmem>>, %arg9: memref<1x1xf32, #tpu.memory_space<vmem>>) attributes {dimension_semantics = [#tpu.dimension_semantics<arbitrary>, #tpu.dimension_semantics<arbitrary>], iteration_bounds = array<i64: 8, 3>, scalar_prefetch = 3 : i64, scratch_operands = 0 : i64, tpu.core_type = #tpu.core_type<tc>, window_params = [{transform_indices = @transform_0, window_bounds = array<i64: 1, 1, 32>}, {transform_indices = @transform_1, window_bounds = array<i64: 1, 1, 32>}, {transform_indices = @transform_2, window_bounds = array<i64: 1, 1, 32>}, {pipeline_mode = #tpu.pipeline_mode<synchronous>, transform_indices = @transform_3, window_bounds = array<i64: 1, 1>}, {pipeline_mode = #tpu.pipeline_mode<synchronous>, transform_indices = @transform_4, window_bounds = array<i64: 1, 1>}]} {
    %c0_i32 = arith.constant 0 : i32
    %0 = arith.cmpi eq, %arg0, %c0_i32 : i32
    %c0_i32_0 = arith.constant 0 : i32
    %1 = arith.cmpi eq, %arg1, %c0_i32_0 : i32
    %2 = arith.andi %0, %1 : i1
    %3 = arith.extui %2 : i1 to i32
    %c0_i32_1 = arith.constant 0 : i32
    %4 = arith.cmpi ne, %3, %c0_i32_1 : i32
    scf.if %4 {
      %cst_17 = arith.constant 0.000000e+00 : f32
      %31 = vector.broadcast %cst_17 : f32 to vector<1x1xf32>
      %c0_18 = arith.constant 0 : index
      %c0_19 = arith.constant 0 : index
      %32 = vector.load %arg8[%c0_18, %c0_19] : memref<1x1xf32, #tpu.memory_space<vmem>>, vector<1x1xf32>
      tpu.vector_store %arg8[%c0_18, %c0_19], %31 {strides = array<i32>} : memref<1x1xf32, #tpu.memory_space<vmem>>, vector<1x1xf32>,
      %cst_20 = arith.constant 0.000000e+00 : f32
      %33 = vector.broadcast %cst_20 : f32 to vector<1x1xf32>
      %c0_21 = arith.constant 0 : index
      %c0_22 = arith.constant 0 : index
      %34 = vector.load %arg9[%c0_21, %c0_22] : memref<1x1xf32, #tpu.memory_space<vmem>>, vector<1x1xf32>
      tpu.vector_store %arg9[%c0_21, %c0_22], %33 {strides = array<i32>} : memref<1x1xf32, #tpu.memory_space<vmem>>, vector<1x1xf32>,
    } else {
    }
    %c0 = arith.constant 0 : index
    %c0_2 = arith.constant 0 : index
    %c0_3 = arith.constant 0 : index
    %5 = vector.load %arg5[%c0, %c0_2, %c0_3] : memref<1x1x32xf32, #tpu.memory_space<vmem>>, vector<1x1x32xf32>
    %6 = vector.shape_cast %5 : vector<1x1x32xf32> to vector<1x32xf32>
    %7 = arith.mulf %6, %6 : vector<1x32xf32>
    %cst = arith.constant dense<0.000000e+00> : vector<1xf32>
    %8 = vector.multi_reduction <add>, %7, %cst [1] : vector<1x32xf32> to vector<1xf32>
    %9 = vector.shape_cast %8 : vector<1xf32> to vector<1x1xf32>
    %cst_4 = arith.constant 1.000000e-16 : f32
    %10 = vector.broadcast %cst_4 : f32 to vector<1x1xf32>
    %11 = arith.maximumf %9, %10 : vector<1x1xf32>
    %c0_i32_5 = arith.constant 0 : i32
    %12 = arith.cmpi eq, %arg1, %c0_i32_5 : i32
    %13 = arith.extui %12 : i1 to i32
    %c0_i32_6 = arith.constant 0 : i32
    %14 = arith.cmpi ne, %13, %c0_i32_6 : i32
    scf.if %14 {
      %c0_17 = arith.constant 0 : index
      %c0_18 = arith.constant 0 : index
      %c0_19 = arith.constant 0 : index
      %31 = vector.load %arg6[%c0_17, %c0_18, %c0_19] : memref<1x1x32xf32, #tpu.memory_space<vmem>>, vector<1x1x32xf32>
      %32 = vector.shape_cast %31 : vector<1x1x32xf32> to vector<1x32xf32>
      %33 = arith.mulf %32, %32 : vector<1x32xf32>
      %cst_20 = arith.constant dense<0.000000e+00> : vector<1xf32>
      %34 = vector.multi_reduction <add>, %33, %cst_20 [1] : vector<1x32xf32> to vector<1xf32>
      %35 = vector.shape_cast %34 : vector<1xf32> to vector<1x1xf32>
      %cst_21 = arith.constant 1.000000e-16 : f32
      %36 = vector.broadcast %cst_21 : f32 to vector<1x1xf32>
      %37 = arith.maximumf %35, %36 : vector<1x1xf32>
      %38 = arith.mulf %6, %32 : vector<1x32xf32>
      %cst_22 = arith.constant dense<0.000000e+00> : vector<1xf32>
      %39 = vector.multi_reduction <add>, %38, %cst_22 [1] : vector<1x32xf32> to vector<1xf32>
      %40 = vector.shape_cast %39 : vector<1xf32> to vector<1x1xf32>
      %c0_23 = arith.constant 0 : index
      %c0_24 = arith.constant 0 : index
      %41 = vector.load %arg8[%c0_23, %c0_24] : memref<1x1xf32, #tpu.memory_space<vmem>>, vector<1x1xf32>
      %42 = arith.mulf %11, %37 : vector<1x1xf32>
      %43 = math.rsqrt %42 : vector<1x1xf32>
      %44 = arith.mulf %40, %43 : vector<1x1xf32>
      %45 = arith.addf %41, %44 : vector<1x1xf32>
      %c0_25 = arith.constant 0 : index
      %c0_26 = arith.constant 0 : index
      %46 = vector.load %arg8[%c0_25, %c0_26] : memref<1x1xf32, #tpu.memory_space<vmem>>, vector<1x1xf32>
      tpu.vector_store %arg8[%c0_25, %c0_26], %45 {strides = array<i32>} : memref<1x1xf32, #tpu.memory_space<vmem>>, vector<1x1xf32>,
    } else {
    }
    %c0_7 = arith.constant 0 : index
    %c0_8 = arith.constant 0 : index
    %c0_9 = arith.constant 0 : index
    %15 = vector.load %arg7[%c0_7, %c0_8, %c0_9] : memref<1x1x32xf32, #tpu.memory_space<vmem>>, vector<1x1x32xf32>
    %16 = vector.shape_cast %15 : vector<1x1x32xf32> to vector<1x32xf32>
    %17 = arith.mulf %16, %16 : vector<1x32xf32>
    %cst_10 = arith.constant dense<0.000000e+00> : vector<1xf32>
    %18 = vector.multi_reduction <add>, %17, %cst_10 [1] : vector<1x32xf32> to vector<1xf32>
    %19 = vector.shape_cast %18 : vector<1xf32> to vector<1x1xf32>
    %cst_11 = arith.constant 1.000000e-16 : f32
    %20 = vector.broadcast %cst_11 : f32 to vector<1x1xf32>
    %21 = arith.maximumf %19, %20 : vector<1x1xf32>
    %22 = arith.mulf %6, %16 : vector<1x32xf32>
    %cst_12 = arith.constant dense<0.000000e+00> : vector<1xf32>
    %23 = vector.multi_reduction <add>, %22, %cst_12 [1] : vector<1x32xf32> to vector<1xf32>
    %24 = vector.shape_cast %23 : vector<1xf32> to vector<1x1xf32>
    %c0_13 = arith.constant 0 : index
    %c0_14 = arith.constant 0 : index
    %25 = vector.load %arg9[%c0_13, %c0_14] : memref<1x1xf32, #tpu.memory_space<vmem>>, vector<1x1xf32>
    %26 = arith.mulf %11, %21 : vector<1x1xf32>
    %27 = math.rsqrt %26 : vector<1x1xf32>
    %28 = arith.mulf %24, %27 : vector<1x1xf32>
    %29 = arith.addf %25, %28 : vector<1x1xf32>
    %c0_15 = arith.constant 0 : index
    %c0_16 = arith.constant 0 : index
    %30 = vector.load %arg9[%c0_15, %c0_16] : memref<1x1xf32, #tpu.memory_space<vmem>>, vector<1x1xf32>
    tpu.vector_store %arg9[%c0_15, %c0_16], %29 {strides = array<i32>} : memref<1x1xf32, #tpu.memory_space<vmem>>, vector<1x1xf32>,
    return
  }
  func.func @transform_0(%arg0: i32, %arg1: i32, %arg2: memref<8xi32, #tpu.memory_space<smem>>, %arg3: memref<8xi32, #tpu.memory_space<smem>>, %arg4: memref<24xi32, #tpu.memory_space<smem>>) -> (i32, i32, i32) {
    %0 = arith.index_cast %arg0 : i32 to index
    %1 = memref.load %arg2[%0] : memref<8xi32, #tpu.memory_space<smem>>
    %c0_i32 = arith.constant 0 : i32
    %c0_i32_0 = arith.constant 0 : i32
    %c0_i32_1 = arith.constant 0 : i32
    return %1, %c0_i32, %c0_i32_0 : i32, i32, i32
  }
  func.func @transform_1(%arg0: i32, %arg1: i32, %arg2: memref<8xi32, #tpu.memory_space<smem>>, %arg3: memref<8xi32, #tpu.memory_space<smem>>, %arg4: memref<24xi32, #tpu.memory_space<smem>>) -> (i32, i32, i32) {
    %0 = arith.index_cast %arg0 : i32 to index
    %1 = memref.load %arg3[%0] : memref<8xi32, #tpu.memory_space<smem>>
    %c0_i32 = arith.constant 0 : i32
    %c0_i32_0 = arith.constant 0 : i32
    %c0_i32_1 = arith.constant 0 : i32
    return %1, %c0_i32, %c0_i32_0 : i32, i32, i32
  }
  func.func @transform_2(%arg0: i32, %arg1: i32, %arg2: memref<8xi32, #tpu.memory_space<smem>>, %arg3: memref<8xi32, #tpu.memory_space<smem>>, %arg4: memref<24xi32, #tpu.memory_space<smem>>) -> (i32, i32, i32) {
    %c3_i32 = arith.constant 3 : i32
    %0 = arith.muli %arg0, %c3_i32 : i32
    %1 = arith.addi %0, %arg1 : i32
    %2 = arith.index_cast %1 : i32 to index
    %3 = memref.load %arg4[%2] : memref<24xi32, #tpu.memory_space<smem>>
    %c0_i32 = arith.constant 0 : i32
    %c0_i32_0 = arith.constant 0 : i32
    %c0_i32_1 = arith.constant 0 : i32
    return %3, %c0_i32, %c0_i32_0 : i32, i32, i32
  }
  func.func @transform_3(%arg0: i32, %arg1: i32, %arg2: memref<8xi32, #tpu.memory_space<smem>>, %arg3: memref<8xi32, #tpu.memory_space<smem>>, %arg4: memref<24xi32, #tpu.memory_space<smem>>) -> (i32, i32) {
    %c0_i32 = arith.constant 0 : i32
    %c0_i32_0 = arith.constant 0 : i32
    %c0_i32_1 = arith.constant 0 : i32
    return %c0_i32, %c0_i32_0 : i32, i32
  }
  func.func @transform_4(%arg0: i32, %arg1: i32, %arg2: memref<8xi32, #tpu.memory_space<smem>>, %arg3: memref<8xi32, #tpu.memory_space<smem>>, %arg4: memref<24xi32, #tpu.memory_space<smem>>) -> (i32, i32) {
    %c0_i32 = arith.constant 0 : i32
    %c0_i32_0 = arith.constant 0 : i32
    %c0_i32_1 = arith.constant 0 : i32
    return %c0_i32, %c0_i32_0 : i32, i32
  }
}

</mosaic_0001>

<bundles_post_ra>
// kernel: tpu_custom_call.1
= control target key start
LH: loop header
LB: loop body
LE: loop exit
PB: predicated region body
PF: predicated region fallthrough
CT: control target
= control target key end

     0   :  { %s806_s0 = inlined_call_operand.vmem [shape: s32[8], index: 0, kind: input, shape index: {}]   ;;  %s807_s3 = inlined_call_operand.vmem [shape: f32[64,1,32], index: 3, kind: input, shape index: {}]   ;;  %s808_s4 = inlined_call_operand.vmem [shape: f32[64,1,32], index: 4, kind: input, shape index: {}]   ;;  %s809_s5 = inlined_call_operand.vmem [shape: f32[64,1,32], index: 5, kind: input, shape index: {}]   ;;  %s810_s6 = inlined_call_operand.hbm [shape: f32[1,1], index: 6, kind: output, shape index: {0}]   ;;  %s811_s7 = inlined_call_operand.hbm [shape: f32[1,1], index: 7, kind: output, shape index: {1}]   ;;  %s812_s1 = inlined_call_operand.vmem [shape: s32[8], index: 1, kind: input, shape index: {}]   ;;  %s813_s2 = inlined_call_operand.vmem [shape: s32[24], index: 2, kind: input, shape index: {}]  }
   0x1   :  { %s13_s26 = sshll.u32 %s806_s0, 4  ;;  %s17_s29 = sshll.u32 %s812_s1, 4  ;;  %s14_s26 = int_to_ptr.vmem [resolvable:$true] %s13_s26  ;;  %s18_s29 = int_to_ptr.vmem [resolvable:$true] %s17_s29 }
   0x2   :  { %s490_s30 = scalar_lea.vmem %s14_s26, 16  ;;  %p495_p1 = scmp.lt.s32.totalorder %s14_s26, %s14_s26 }
   0x3   :  { %p491_p0 = scmp.ne.s32.totalorder %s14_s26, %s490_s30  ;;  %p496_p2 = scmp.lt.s32.totalorder %s490_s30, %s490_s30 }
   0x5   :  { %p497_p3 = por %p496_p2, %p495_p1 }
   0x7   :  { %p498_p4 = pnand %p497_p3, %p491_p0 }
   0x9   :  { %501 = shalt.err (!%p498_p4)  }
   0xa   :  { %s628_s8 = smov [#allocation3]   ;;  %s502_s9 = scalar_lea.vmem %s18_s29, 16 }
   0xb   :  { %16 = dma.vmem_to_smem %s14_s26, 16, %s628_s8, [#allocation2] }
   0xc   :  { %p503_p5 = scmp.ne.s32.totalorder %s18_s29, %s502_s9  ;;  %p507_p6 = scmp.lt.s32.totalorder %s18_s29, %s18_s29 }
   0xd   :  { %p508_p7 = scmp.lt.s32.totalorder %s502_s9, %s502_s9 }
   0xf   :  { %p509_p8 = por %p508_p7, %p507_p6 }
  0x11   :  { %p510_p9 = pnand %p509_p8, %p503_p5 }
  0x13   :  { %513 = shalt.err (!%p510_p9)  }
  0x14   :  { %s629_s0 = smov [#allocation4]   ;;  %s21_s11 = sshll.u32 %s813_s2, 4  ;;  %s22_s11 = int_to_ptr.vmem [resolvable:$true] %s21_s11 }
  0x15   :  { %20 = dma.vmem_to_smem %s18_s29, 16, %s629_s0, [#allocation2] }
  0x16   :  { %s514_s12 = scalar_lea.vmem %s22_s11, 16  ;;  %p519_p11 = scmp.lt.s32.totalorder %s22_s11, %s22_s11 }
  0x17   :  { %p515_p10 = scmp.ne.s32.totalorder %s22_s11, %s514_s12  ;;  %p520_p12 = scmp.lt.s32.totalorder %s514_s12, %s514_s12 }
  0x19   :  { %p521_p13 = por %p520_p12, %p519_p11 }
  0x1b   :  { %p522_p0 = pnand %p521_p13, %p515_p10 }
  0x1d   :  { %525 = shalt.err (!%p522_p0)  }
  0x1e   :  { %s630_s13 = smov [#allocation5]  }
  0x1f   :  { %24 = dma.vmem_to_smem %s22_s11, 16, %s630_s13, [#allocation2] }
  0x20   :  { %598 = dma.done.wait [#allocation2], 48 }
  0x21   :  { %599 = vsyncadd [#allocation2], 4294967248 }
  0x22   :  { %26 = sfence }
  0x23   :  { %27 = vsyncpa [#allocation7], 0 }
  0x24   :  { %28 = vsyncpa [#allocation9], 0  ;;  %s683_s14 = smov 0   ;;  %s685_s15 = smov 0  }
  0x25   :  { %s687_s2 = smov 0   ;;  %s689_s16 = smov 0  }
  0x26   :  { %s691_s17 = smov 0  }
  0x27 LB: > { %s417_s18 = sadd.s32 4294967295, %s626_s17   ;;  %s43_s19 = sadd.s32 1, %s618_s2  ;;  %s626_s17 = sphi %s691_s17, %s34_s17   ;;  %s622_s16 = sphi %s689_s16, %s818_s16   ;;  %s618_s2 = sphi %s687_s2, %s817_s2   ;;  %s614_s15 = sphi %s685_s15, %s816_s15   ;;  %s610_s14 = sphi %s683_s14, %s815_s14  }
  0x28   : > { %p44_p1 = scmp.ge.s32.totalorder %s43_s19, 3  ;;  %s46_s20 = sadd.s32 1, %s622_s16 }
  0x29   : > { %p420_p2 = scmp.ge.s32.totalorder %s626_s17, 1  ;;  %p220_p3 = scmp.lt.s32.totalorder %s626_s17, 25 }
  0x2a   : > { %s820_s19 = smov (%p44_p1, %s43_s19), 0  ;;  %s822_s20 = smov (!%p44_p1, %s46_s20), %s622_s16 }
  0x2b   : > { %p221_p4 = pnand %p420_p2, %p220_p3  ;;  %p48_p5 = scmp.ge.s32.totalorder %s822_s20, 8 }
  0x2c   : > { %s250_s21 = sld [smem:[#allocation3 + %s614_s15]] (!%p221_p4)  ;;  %s260_s23 = smul.u32 (!%p221_p4), 3, %s614_s15 }
  0x2d   : > { %s824_s20 = smov (%p48_p5, %s822_s20), 0  ;;  %224 = sbr.rel (%p221_p4) target bundleno = 412 (0x19c), region = 32 }
  0x2e   : > { %s255_s22 = sld [smem:[#allocation4 + %s614_s15]] (!%p221_p4)  ;;  %p269_p6 = scmp.eq.s32.totalorder (!%p221_p4), %s614_s15, 0 }
  0x2f   : > { %p270_p7 = scmp.eq.s32.totalorder (!%p221_p4), %s610_s14, 0  ;;  %s261_s24 = sadd.s32 (!%p221_p4), %s610_s14, %s260_s23 }
  0x30   : > { %s262_s25 = sld [smem:[#allocation5 + %s261_s24]] (!%p221_p4) }
  0x31   : > { %p271_p8 = pnand (!%p221_p4), %p270_p7, %p269_p6 }
  0x32   : > { %p251_p9 = scmp.lt.s32.totalorder (!%p221_p4), %s250_s21, 63 }
  0x34   : > { %p256_p10 = scmp.lt.s32.totalorder %s255_s22, 63  ;;  %s826_s21 = smov (!%p251_p9, %s250_s21), 63  ;;  %vm275_vm0 = vcmask (!%p271_p8), 0   ;;  %v631_v0 = vmov (!%p271_p8), 0.0  }
  0x35   : > { %s253_s28 = scalar_lea.vmem %s807_s3, %s826_s21  ;;  %274 = sbr.rel (%p271_p8) target bundleno = 60 (0x3c), region = 36  ;;  %276 = vst.msk [vmem:[#allocation6] sm:$0x1] (!%p271_p8), %vm275_vm0, %v631_v0  ;;  %277 = vst.msk [vmem:[#allocation8] sm:$0x1] (!%p271_p8), %vm275_vm0, %v631_v0 }
  0x36   : > { %s828_s22 = smov (!%p256_p10, %s255_s22), 63  ;;  %p263_p11 = scmp.lt.s32.totalorder %s262_s25, 63 }
  0x37   : > { %s258_s8 = scalar_lea.vmem %s808_s4, %s828_s22 }
  0x38   : > { %s830_s25 = smov (!%p263_p11, %s262_s25), 63 }
  0x39   : > { %s265_s1 = scalar_lea.vmem %s809_s5, %s830_s25 }
  0x3c PF: > { %v278_v1 = vld [vmem:[%s253_s28] sm:$0x1]  ;;  %vm280_vm1 = vcmask 253952   ;;  %p421_p12 = scmp.ne.s32.totalorder %s610_s14, 0 }
  0x3d   : > { %v279_v2 = vmul.f32 %v278_v1, %v278_v1  ;;  %v288_v6 = vld [vmem:[%s258_s8] sm:$0x1] (!%p421_p12)  ;;  %vm303_vm2 = vcmask (!%p421_p12), 0  }
  0x3e   : > { %v289_v7 = vmul.f32 (!%p421_p12), %v288_v6, %v288_v6  ;;  %v294_v8 = vmul.f32 (!%p421_p12), %v288_v6, %v278_v1  ;;  %v298_v16 = vld [vmem:[#allocation6] sm:$0x1] (!%p421_p12) }
  0x3f   : > { %v281_v3 = vsel %vm280_vm1, %v279_v2, 0.0 }
  0x40   : > { %282 = vadd.xlane.f32.xlu0 %v281_v3  ;;  %v290_v9 = vsel (!%p421_p12), %vm280_vm1, %v289_v7, 0.0  ;;  %v295_v10 = vsel (!%p421_p12), %vm280_vm1, %v294_v8, 0.0 }
  0x44   : > { %291 = vadd.xlane.f32.xlu0 (!%p421_p12), %v290_v9 }
  0x48   : > { %296 = vadd.xlane.f32.xlu0 (!%p421_p12), %v295_v10 }
  0xc8   : > { %287 = sbr.rel (%p421_p12) target bundleno = 230 (0xe6), region = 40 }
  0xcd   : > { %v283_v4 = vpop.xlane.xlu0 %282 }
  0xce   : > { %v284_v5 = vmax.f32 %v283_v4, 1e-16 }
  0xd1   : > { %v292_v11 = vpop.xlane.xlu0 %291 }
  0xd2   : > { %v293_v12 = vmax.f32 %v292_v11, 1e-16 }
  0xd4   : > { %v299_v13 = vmul.f32 %v293_v12, %v284_v5 }
  0xd5   : > { %v297_v14 = vpop.xlane.xlu0 %296 }
  0xd6   : > { %486 = vrsqrt.f32 %v299_v13 }
  0xe0   : > { %v487_v15 = vpop.eup %486 }
  0xe1   : > { %v301_v17 = vmul.f32 %v487_v15, %v297_v14 }
  0xe3   : > { %v302_v18 = vadd.f32 %v301_v17, %v298_v16 }
  0xe5   : > { %304 = vst.msk [vmem:[#allocation6] sm:$0x1] %vm303_vm2, %v302_v18 }
  0xe6 PF: > { %v305_v19 = vld [vmem:[%s265_s1] sm:$0x1]  ;;  %p743_p13 = scmp.eq.s32.totalorder %s417_s18, 23  ;;  %s632_s13 = smov [#allocation6]  }
  0xe7   : > { %v306_v20 = vmul.f32 %v305_v19, %v305_v19  ;;  %v311_v21 = vmul.f32 %v305_v19, %v278_v1  ;;  %s329_s14 = sshll.u32 %s632_s13, 4  ;;  %s330_s14 = int_to_ptr.vmem [resolvable:$true] %s329_s14 }
  0xe8   : > { %s526_s15 = scalar_lea.vmem %s330_s14, 16  ;;  %s532_s21 = scalar_lea.vmem %s330_s14, 32 }
  0xe9   : > { %v307_v22 = vsel %vm280_vm1, %v306_v20, 0.0  ;;  %v312_v23 = vsel %vm280_vm1, %v311_v21, 0.0  ;;  %p527_p0 = scmp.ne.s32.totalorder %s330_s14, %s526_s15  ;;  %p533_p3 = scmp.lt.s32.totalorder %s330_s14, %s330_s14 }
  0xea   : > { %308 = vadd.xlane.f32.xlu0 %v307_v22  ;;  %p534_p4 = scmp.lt.s32.totalorder %s532_s21, %s526_s15 }
  0xeb   : > { %p528_p1 = pnand %p527_p0, %p743_p13 }
  0xec   : > { %p535_p5 = por %p534_p4, %p533_p3 }
  0xed   : > { %p529_p2 = pneg %p528_p1 }
  0xee   : > { %313 = vadd.xlane.f32.xlu0 %v312_v23 }
  0xef   : > { %p536_p6 = pnand %p535_p5, %p529_p2 }
  0xf1   : > { %539 = shalt.err (!%p536_p6)
}
  0xf2   : > { %s540_s23 = scalar_lea.hbm %s810_s6, 16 }
  0xf3   : > { %p541_p7 = scmp.ne.s32.totalorder %s810_s6, %s540_s23  ;;  %p546_p10 = scmp.lt.u32.totalorder %s540_s23, %s810_s6 }
  0xf5   : > { %p542_p8 = pnand %p541_p7, %p743_p13 }
  0xf7   : > { %p543_p9 = pneg %p542_p8 }
  0xf9   : > { %p548_p11 = pnand %p546_p10, %p543_p9 }
  0xfb   : > { %551 = shalt.err (!%p548_p11)
}
  0xfc   : > { %429 = dma.vmem_to_hbm [thread:$0]  (%p743_p13), %s330_s14, 16, %s810_s6, [#allocation7]   ;;  %v315_v29 = vld [vmem:[#allocation8] sm:$0x1]  ;;  %vm320_vm3 = vcmask 0  }
  0xfd   : > { %s633_s30 = smov [#allocation8]  }
  0xfe   : > { %s340_s8 = sshll.u32 %s633_s30, 4  ;;  %s341_s8 = int_to_ptr.vmem [resolvable:$true] %s340_s8 }
  0xff   : > { %s552_s9 = scalar_lea.vmem %s341_s8, 16  ;;  %s558_s0 = scalar_lea.vmem %s341_s8, 32 }
 0x100   : > { %p553_p12 = scmp.ne.s32.totalorder %s341_s8, %s552_s9  ;;  %p559_p2 = scmp.lt.s32.totalorder %s341_s8, %s341_s8 }
 0x101   : > { %p560_p3 = scmp.lt.s32.totalorder %s558_s0, %s552_s9 }
 0x102   : > { %p554_p0 = pnand %p553_p12, %p743_p13 }
 0x103   : > { %p561_p4 = por %p560_p3, %p559_p2 }
 0x104   : > { %p555_p1 = pneg %p554_p0 }
 0x106   : > { %p562_p5 = pnand %p561_p4, %p555_p1 }
 0x177   : > { %v309_v24 = vpop.xlane.xlu0 %308 }
 0x178   : > { %v310_v25 = vmax.f32 %v309_v24, 1e-16 }
 0x17a   : > { %v316_v26 = vmul.f32 %v310_v25, %v284_v5 }
 0x17b   : > { %v314_v27 = vpop.xlane.xlu0 %313 }
 0x17c   : > { %488 = vrsqrt.f32 %v316_v26 }
 0x186   : > { %v489_v28 = vpop.eup %488 }
 0x187   : > { %v318_v30 = vmul.f32 %v489_v28, %v314_v27 }
 0x189   : > { %v319_v31 = vadd.f32 %v318_v30, %v315_v29 }
 0x18b   : > { %321 = vst.msk [vmem:[#allocation8] sm:$0x1] %vm320_vm3, %v319_v31 }
 0x18c   : > { %565 = shalt.err (!%p562_p5)
}
 0x18d   : > { %s566_s11 = scalar_lea.hbm %s811_s7, 16 }
 0x18e   : > { %p567_p6 = scmp.ne.s32.totalorder %s811_s7, %s566_s11  ;;  %p572_p9 = scmp.lt.u32.totalorder %s566_s11, %s811_s7 }
 0x190   : > { %p568_p7 = pnand %p567_p6, %p743_p13 }
 0x192   : > { %p569_p8 = pneg %p568_p7 }
 0x194   : > { %p574_p10 = pnand %p572_p9, %p569_p8 }
 0x196   : > { %577 = shalt.err (!%p574_p10)
}
 0x197   : > { %431 = dma.vmem_to_hbm [thread:$0]  (%p743_p13), %s341_s8, 16, %s811_s7, [#allocation9]  }
 0x198   : > { %601 = dma.done.wait (%p743_p13), [#allocation7], 16  }
 0x199   : > { %603 = vsyncadd (%p743_p13), [#allocation7], 4294967280 }
 0x19a   : > { %605 = dma.done.wait (%p743_p13), [#allocation9], 16  }
 0x19b   : > { %607 = vsyncadd (%p743_p13), [#allocation9], 4294967280 }
 0x19c PF: > { %s34_s17 = sadd.s32 1, %s626_s17   ;;  %s815_s14 = smov %s618_s2 }
 0x19d   : > { %p31_p11 = scmp.ge.s32.totalorder %s34_s17, 26   ;;  %s816_s15 = smov %s622_s16 }
 0x19e   : > { %s817_s2 = smov %s820_s19  ;;  %s818_s16 = smov %s824_s20 }
 0x19f   :  { %33 = sbr.rel (!%p31_p11) target bundleno = 39 (0x27), region = 81 }
 0x1a6   :  { %357 = vsyncpa [#allocation7], 1 }
 0x1a7   :  { %359 = vsyncpa [#allocation7 + $0x1], 1 }
 0x1a8   :  { %360 = vsyncpa [#allocation9], 1 }

</bundles_post_ra>
